<compile_context>
chip_gen: v7x
topology: tpu7x:2x2x1
jax: 0.10.0
libtpu: 0.0.40
codegen_flags: <defaults>
</compile_context>

<pallas_src>
import functools

import jax
import jax.numpy as jnp
from jax.experimental import pallas as pl
from jax.experimental.pallas import tpu as pltpu

NUM_LAYERS = 10
LANE = 128


def _round_up(v, m):
    return (v + m - 1) // m * m


def _vmem_capacity_bytes():
    """Generation-aware VMEM capacity (v5e/v6e: 128 MiB; v7x: 64 MiB per TC)."""
    try:
        cap = int(pltpu.get_tpu_info().vmem_capacity_bytes)
        if cap > 0:
            return cap
    except Exception:
        pass
    return 64 * 1024 * 1024  # conservative fallback, safe on every generation


# ----------------------------------------------------------------------------
# Kernels
# ----------------------------------------------------------------------------
def _resident_mlp_kernel(x_ref, w_ref, b_ref, o_ref, *, num_layers):
    # grid = (batch_tiles,)  -- single 'parallel' axis.
    # x_ref : (TM, S_pad)         activation tile (input dtype)
    # w_ref : (L, S_pad, S_pad)   full weight stack, resident in VMEM, [in, out]
    # b_ref : (L, 1, S_pad)       full bias stack, resident in VMEM
    # o_ref : (TM, S_pad)         output tile
    h = x_ref[...].astype(jnp.float32)
    # L is a compile-time constant: full unroll with static indices gives the
    # LLO scheduler visibility over the whole layer chain.
    for i in range(num_layers):
        w = w_ref[i]                                   # (S_pad, S_pad)
        y = jnp.dot(h.astype(w.dtype), w, preferred_element_type=jnp.float32)
        h = y + b_ref[i].astype(jnp.float32)           # (1, S_pad) broadcasts
    o_ref[...] = h.astype(o_ref.dtype)


def _streamed_mlp_kernel(x_ref, w_ref, b_ref, o_ref, h_ref, *, num_layers):
    # grid = (batch_tiles [parallel], layers [arbitrary])
    # x_ref : (TM, S_pad)         activation tile
    # w_ref : (1, S_pad, S_pad)   one layer's weights per grid step
    # b_ref : (L, 1, S_pad)       all biases, resident (tiny)
    # o_ref : (TM, S_pad)         resident across the layer axis
    # h_ref : (TM, S_pad) f32     resident activation scratch
    layer = pl.program_id(1)

    @pl.when(layer == 0)
    def _():
        h_ref[...] = x_ref[...].astype(jnp.float32)

    w = w_ref[0]                                       # (S_pad, S_pad)
    y = jnp.dot(h_ref[...].astype(w.dtype), w, preferred_element_type=jnp.float32)
    y = y + b_ref[layer].astype(jnp.float32)           # dynamic first-axis index
    h_ref[...] = y

    @pl.when(layer == num_layers - 1)
    def _():
        o_ref[...] = y.astype(o_ref.dtype)


# ----------------------------------------------------------------------------
# Host-side wrappers
# ----------------------------------------------------------------------------
def prepare_params(w_t, b, s_pad, weight_dtype=None):
    """One-time (hoisted) padding / cast of the weight and bias stacks.

    w_t : (L, S, S) pre-transposed weights [in, out]
    b   : (L, S)    biases
    Returns (L, s_pad, s_pad) weights and (L, 1, s_pad) f32 biases.
    """
    L, S, _ = w_t.shape
    assert b.shape == (L, S)
    w_p = jnp.pad(w_t, ((0, 0), (0, s_pad - S), (0, s_pad - S)))
    if weight_dtype is not None:
        w_p = w_p.astype(weight_dtype)
    b_p = jnp.pad(b, ((0, 0), (0, s_pad - S)))[:, None, :].astype(jnp.float32)
    return w_p, b_p


def some_module_forward(x, w_p, b_p, *, force_streamed=False):
    """Forward pass of SomeModule.

    x   : (B, S)               activations
    w_p : (L, S_pad, S_pad)    padded pre-transposed weights (f32 or bf16)
    b_p : (L, 1, S_pad)        padded f32 biases
    """
    B, S = x.shape
    L, S_pad, _ = w_p.shape
    assert S_pad >= S and S_pad % LANE == 0
    assert b_p.shape == (L, 1, S_pad)

    x_item = jnp.dtype(x.dtype).itemsize
    w_item = jnp.dtype(w_p.dtype).itemsize
    # Sub-lane floor depends on the activation dtype (f32: 8, bf16: 16, int8: 32).
    sub = 8 if x_item >= 4 else (16 if x_item == 2 else 32)

    vmem_cap = _vmem_capacity_bytes()
    vmem_limit = int(0.85 * vmem_cap)

    w_bytes = L * S_pad * S_pad * w_item
    b_bytes = L * S_pad * 4
    # Resident path only when the whole stack fits with plenty of headroom
    # (Pallas may still double-buffer the block).
    resident = (not force_streamed) and (w_bytes + b_bytes) <= vmem_cap // 4

    # ---- batch tiling -------------------------------------------------------
    # Cap TM by remaining VMEM, pick TM to minimize batch padding, and prefer
    # >= 2 batch tiles (keeps both v7x TensorCores busy) when the batch allows.
    if resident:
        act_budget = vmem_cap // 2 - (w_bytes + b_bytes)
        per_row = S_pad * (4 * x_item)                 # x + out double buffers
    else:
        act_budget = vmem_cap // 2 - 2 * (S_pad * S_pad * w_item + S_pad * 4)
        per_row = S_pad * (4 * x_item + 4)             # + resident f32 scratch
    tm_cap = max(sub, min(1024, (act_budget // max(per_row, 1)) // sub * sub))

    n_tiles = max(1, -(-B // tm_cap))
    if B >= 2 * sub:
        n_tiles = max(n_tiles, 2)
    TM = _round_up(-(-B // n_tiles), sub)
    B_pad = n_tiles * TM

    x_p = jnp.pad(x, ((0, B_pad - B), (0, S_pad - S)))

    if resident:
        kernel = functools.partial(_resident_mlp_kernel, num_layers=L)
        out_p = pl.pallas_call(
            kernel,
            out_shape=jax.ShapeDtypeStruct((B_pad, S_pad), x.dtype),
            grid_spec=pltpu.PrefetchScalarGridSpec(
                num_scalar_prefetch=0,
                grid=(B_pad // TM,),
                in_specs=[
                    pl.BlockSpec((TM, S_pad), lambda m: (m, 0)),
                    pl.BlockSpec((L, S_pad, S_pad), lambda m: (0, 0, 0)),  # resident
                    pl.BlockSpec((L, 1, S_pad), lambda m: (0, 0, 0)),      # resident
                ],
                out_specs=pl.BlockSpec((TM, S_pad), lambda m: (m, 0)),
            ),
            compiler_params=pltpu.CompilerParams(
                dimension_semantics=("parallel",),
                vmem_limit_bytes=vmem_limit,
            ),
        )(x_p, w_p, b_p)
    else:
        kernel = functools.partial(_streamed_mlp_kernel, num_layers=L)
        out_p = pl.pallas_call(
            kernel,
            out_shape=jax.ShapeDtypeStruct((B_pad, S_pad), x.dtype),
            grid_spec=pltpu.PrefetchScalarGridSpec(
                num_scalar_prefetch=0,
                grid=(B_pad // TM, L),
                in_specs=[
                    pl.BlockSpec((TM, S_pad), lambda m, l: (m, 0)),
                    pl.BlockSpec((1, S_pad, S_pad), lambda m, l: (l, 0, 0)),
                    pl.BlockSpec((L, 1, S_pad), lambda m, l: (0, 0, 0)),   # resident
                ],
                out_specs=pl.BlockSpec((TM, S_pad), lambda m, l: (m, 0)),
                scratch_shapes=[pltpu.VMEM((TM, S_pad), jnp.float32)],
            ),
            compiler_params=pltpu.CompilerParams(
                dimension_semantics=("parallel", "arbitrary"),
                vmem_limit_bytes=vmem_limit,
            ),
        )(x_p, w_p, b_p)

    return out_p[:B, :S]


# ----------------------------------------------------------------------------
# Reference + test
# ----------------------------------------------------------------------------
def init_params(key, size):
    """Deterministic init mimicking nn.Linear's shapes: W (out,in), b (out,)."""
    ws, bs = [], []
    for i in range(NUM_LAYERS):
        k_w, k_b, key = jax.random.split(jax.random.fold_in(key, i), 3)
        bound = 1.0 / jnp.sqrt(size)
        W = jax.random.uniform(k_w, (size, size), jnp.float32, -bound, bound)
        b = jax.random.uniform(k_b, (size,), jnp.float32, -bound, bound)
        ws.append(W)
        bs.append(b)
    return jnp.stack(ws), jnp.stack(bs)               # (L, out, in), (L, out)


def reference_forward(x, W_stack, b_stack):
    h = x
    for i in range(NUM_LAYERS):
        h = h @ W_stack[i].T + b_stack[i]
    return h


if __name__ == "__main__":
    key = jax.random.PRNGKey(0)
    batch, size = 8, 32

    k_x, k_p = jax.random.split(key)
    x = jax.random.normal(k_x, (batch, size), dtype=jnp.float32)
    W_stack, b_stack = init_params(k_p, size)
    W_t = jnp.transpose(W_stack, (0, 2, 1))           # (L, in, out) for h @ W_t + b

    ref = reference_forward(x, W_stack, b_stack)
    S_pad = _round_up(size, LANE)

    # f32-weight resident path (padding/cast hoisted, done once).
    w_p, b_p = prepare_params(W_t, b_stack, S_pad)
    out = jax.block_until_ready(some_module_forward(x, w_p, b_p))
    assert out.shape == (batch, size)
    assert jnp.allclose(out, ref, atol=1e-4, rtol=1e-4)

    # bf16-weight path (halved weight footprint/DMA, per-layer f32 accumulation).
    w_bf16, b_p16 = prepare_params(W_t, b_stack, S_pad, weight_dtype=jnp.bfloat16)
    out_bf16 = jax.block_until_ready(some_module_forward(x, w_bf16, b_p16))
    assert out_bf16.shape == (batch, size)
    assert jnp.allclose(out_bf16, ref, atol=2e-2, rtol=5e-2)

    # Exercise the streamed fallback (used for hidden sizes whose weight stack
    # would not fit in VMEM) on the same small shape for correctness.
    out_streamed = jax.block_until_ready(
        some_module_forward(x, w_p, b_p, force_streamed=True))
    assert jnp.allclose(out_streamed, ref, atol=1e-4, rtol=1e-4)

    print("KERNEL_OK")
</pallas_src>

<mosaic_0001>
module attributes {stable_mosaic.version = 11 : i64} {
  func.func @_resident_mlp_kernel(%arg0: i32, %arg1: memref<8x128xf32, #tpu.memory_space<vmem>>, %arg2: memref<10x128x128xf32, #tpu.memory_space<vmem>>, %arg3: memref<10x1x128xf32, #tpu.memory_space<vmem>>, %arg4: memref<8x128xf32, #tpu.memory_space<vmem>>) attributes {dimension_semantics = [#tpu.dimension_semantics<parallel>], iteration_bounds = array<i64: 1>, scalar_prefetch = 0 : i64, scratch_operands = 0 : i64, tpu.core_type = #tpu.core_type<tc>, window_params = [{transform_indices = @transform_0, window_bounds = array<i64: 8, 128>}, {pipeline_mode = #tpu.pipeline_mode<synchronous>, transform_indices = @transform_1, window_bounds = array<i64: 10, 128, 128>}, {pipeline_mode = #tpu.pipeline_mode<synchronous>, transform_indices = @transform_2, window_bounds = array<i64: 10, 1, 128>}, {transform_indices = @transform_3, window_bounds = array<i64: 8, 128>}]} {
    %c0 = arith.constant 0 : index
    %c0_0 = arith.constant 0 : index
    %0 = vector.load %arg1[%c0, %c0_0] : memref<8x128xf32, #tpu.memory_space<vmem>>, vector<8x128xf32>
    %c0_1 = arith.constant 0 : index
    %c0_2 = arith.constant 0 : index
    %c0_3 = arith.constant 0 : index
    %1 = vector.load %arg2[%c0_1, %c0_2, %c0_3] : memref<10x128x128xf32, #tpu.memory_space<vmem>>, vector<1x128x128xf32>
    %2 = vector.shape_cast %1 : vector<1x128x128xf32> to vector<128x128xf32>
    %cst = arith.constant dense<0.000000e+00> : vector<8x128xf32>
    %3 = tpu.matmul %0, %2, %cst {dimension_numbers = #tpu.dot_dimension_numbers<[1], [0], [0], [1], [0, 0, 1, 1], [], []>} : vector<8x128xf32>, vector<128x128xf32>, vector<8x128xf32> -> vector<8x128xf32>
    %c0_4 = arith.constant 0 : index
    %c0_5 = arith.constant 0 : index
    %c0_6 = arith.constant 0 : index
    %4 = vector.load %arg3[%c0_4, %c0_5, %c0_6] : memref<10x1x128xf32, #tpu.memory_space<vmem>>, vector<1x1x128xf32>
    %5 = vector.shape_cast %4 : vector<1x1x128xf32> to vector<1x128xf32>
    %6 = vector.broadcast %5 : vector<1x128xf32> to vector<8x128xf32>
    %7 = arith.addf %3, %6 : vector<8x128xf32>
    %c1 = arith.constant 1 : index
    %c0_7 = arith.constant 0 : index
    %c0_8 = arith.constant 0 : index
    %8 = vector.load %arg2[%c1, %c0_7, %c0_8] : memref<10x128x128xf32, #tpu.memory_space<vmem>>, vector<1x128x128xf32>
    %9 = vector.shape_cast %8 : vector<1x128x128xf32> to vector<128x128xf32>
    %cst_9 = arith.constant dense<0.000000e+00> : vector<8x128xf32>
    %10 = tpu.matmul %7, %9, %cst_9 {dimension_numbers = #tpu.dot_dimension_numbers<[1], [0], [0], [1], [0, 0, 1, 1], [], []>} : vector<8x128xf32>, vector<128x128xf32>, vector<8x128xf32> -> vector<8x128xf32>
    %c1_10 = arith.constant 1 : index
    %c0_11 = arith.constant 0 : index
    %c0_12 = arith.constant 0 : index
    %11 = vector.load %arg3[%c1_10, %c0_11, %c0_12] : memref<10x1x128xf32, #tpu.memory_space<vmem>>, vector<1x1x128xf32>
    %12 = vector.shape_cast %11 : vector<1x1x128xf32> to vector<1x128xf32>
    %13 = vector.broadcast %12 : vector<1x128xf32> to vector<8x128xf32>
    %14 = arith.addf %10, %13 : vector<8x128xf32>
    %c2 = arith.constant 2 : index
    %c0_13 = arith.constant 0 : index
    %c0_14 = arith.constant 0 : index
    %15 = vector.load %arg2[%c2, %c0_13, %c0_14] : memref<10x128x128xf32, #tpu.memory_space<vmem>>, vector<1x128x128xf32>
    %16 = vector.shape_cast %15 : vector<1x128x128xf32> to vector<128x128xf32>
    %cst_15 = arith.constant dense<0.000000e+00> : vector<8x128xf32>
    %17 = tpu.matmul %14, %16, %cst_15 {dimension_numbers = #tpu.dot_dimension_numbers<[1], [0], [0], [1], [0, 0, 1, 1], [], []>} : vector<8x128xf32>, vector<128x128xf32>, vector<8x128xf32> -> vector<8x128xf32>
    %c2_16 = arith.constant 2 : index
    %c0_17 = arith.constant 0 : index
    %c0_18 = arith.constant 0 : index
    %18 = vector.load %arg3[%c2_16, %c0_17, %c0_18] : memref<10x1x128xf32, #tpu.memory_space<vmem>>, vector<1x1x128xf32>
    %19 = vector.shape_cast %18 : vector<1x1x128xf32> to vector<1x128xf32>
    %20 = vector.broadcast %19 : vector<1x128xf32> to vector<8x128xf32>
    %21 = arith.addf %17, %20 : vector<8x128xf32>
    %c3 = arith.constant 3 : index
    %c0_19 = arith.constant 0 : index
    %c0_20 = arith.constant 0 : index
    %22 = vector.load %arg2[%c3, %c0_19, %c0_20] : memref<10x128x128xf32, #tpu.memory_space<vmem>>, vector<1x128x128xf32>
    %23 = vector.shape_cast %22 : vector<1x128x128xf32> to vector<128x128xf32>
    %cst_21 = arith.constant dense<0.000000e+00> : vector<8x128xf32>
    %24 = tpu.matmul %21, %23, %cst_21 {dimension_numbers = #tpu.dot_dimension_numbers<[1], [0], [0], [1], [0, 0, 1, 1], [], []>} : vector<8x128xf32>, vector<128x128xf32>, vector<8x128xf32> -> vector<8x128xf32>
    %c3_22 = arith.constant 3 : index
    %c0_23 = arith.constant 0 : index
    %c0_24 = arith.constant 0 : index
    %25 = vector.load %arg3[%c3_22, %c0_23, %c0_24] : memref<10x1x128xf32, #tpu.memory_space<vmem>>, vector<1x1x128xf32>
    %26 = vector.shape_cast %25 : vector<1x1x128xf32> to vector<1x128xf32>
    %27 = vector.broadcast %26 : vector<1x128xf32> to vector<8x128xf32>
    %28 = arith.addf %24, %27 : vector<8x128xf32>
    %c4 = arith.constant 4 : index
    %c0_25 = arith.constant 0 : index
    %c0_26 = arith.constant 0 : index
    %29 = vector.load %arg2[%c4, %c0_25, %c0_26] : memref<10x128x128xf32, #tpu.memory_space<vmem>>, vector<1x128x128xf32>
    %30 = vector.shape_cast %29 : vector<1x128x128xf32> to vector<128x128xf32>
    %cst_27 = arith.constant dense<0.000000e+00> : vector<8x128xf32>
    %31 = tpu.matmul %28, %30, %cst_27 {dimension_numbers = #tpu.dot_dimension_numbers<[1], [0], [0], [1], [0, 0, 1, 1], [], []>} : vector<8x128xf32>, vector<128x128xf32>, vector<8x128xf32> -> vector<8x128xf32>
    %c4_28 = arith.constant 4 : index
    %c0_29 = arith.constant 0 : index
    %c0_30 = arith.constant 0 : index
    %32 = vector.load %arg3[%c4_28, %c0_29, %c0_30] : memref<10x1x128xf32, #tpu.memory_space<vmem>>, vector<1x1x128xf32>
    %33 = vector.shape_cast %32 : vector<1x1x128xf32> to vector<1x128xf32>
    %34 = vector.broadcast %33 : vector<1x128xf32> to vector<8x128xf32>
    %35 = arith.addf %31, %34 : vector<8x128xf32>
    %c5 = arith.constant 5 : index
    %c0_31 = arith.constant 0 : index
    %c0_32 = arith.constant 0 : index
    %36 = vector.load %arg2[%c5, %c0_31, %c0_32] : memref<10x128x128xf32, #tpu.memory_space<vmem>>, vector<1x128x128xf32>
    %37 = vector.shape_cast %36 : vector<1x128x128xf32> to vector<128x128xf32>
    %cst_33 = arith.constant dense<0.000000e+00> : vector<8x128xf32>
    %38 = tpu.matmul %35, %37, %cst_33 {dimension_numbers = #tpu.dot_dimension_numbers<[1], [0], [0], [1], [0, 0, 1, 1], [], []>} : vector<8x128xf32>, vector<128x128xf32>, vector<8x128xf32> -> vector<8x128xf32>
    %c5_34 = arith.constant 5 : index
    %c0_35 = arith.constant 0 : index
    %c0_36 = arith.constant 0 : index
    %39 = vector.load %arg3[%c5_34, %c0_35, %c0_36] : memref<10x1x128xf32, #tpu.memory_space<vmem>>, vector<1x1x128xf32>
    %40 = vector.shape_cast %39 : vector<1x1x128xf32> to vector<1x128xf32>
    %41 = vector.broadcast %40 : vector<1x128xf32> to vector<8x128xf32>
    %42 = arith.addf %38, %41 : vector<8x128xf32>
    %c6 = arith.constant 6 : index
    %c0_37 = arith.constant 0 : index
    %c0_38 = arith.constant 0 : index
    %43 = vector.load %arg2[%c6, %c0_37, %c0_38] : memref<10x128x128xf32, #tpu.memory_space<vmem>>, vector<1x128x128xf32>
    %44 = vector.shape_cast %43 : vector<1x128x128xf32> to vector<128x128xf32>
    %cst_39 = arith.constant dense<0.000000e+00> : vector<8x128xf32>
    %45 = tpu.matmul %42, %44, %cst_39 {dimension_numbers = #tpu.dot_dimension_numbers<[1], [0], [0], [1], [0, 0, 1, 1], [], []>} : vector<8x128xf32>, vector<128x128xf32>, vector<8x128xf32> -> vector<8x128xf32>
    %c6_40 = arith.constant 6 : index
    %c0_41 = arith.constant 0 : index
    %c0_42 = arith.constant 0 : index
    %46 = vector.load %arg3[%c6_40, %c0_41, %c0_42] : memref<10x1x128xf32, #tpu.memory_space<vmem>>, vector<1x1x128xf32>
    %47 = vector.shape_cast %46 : vector<1x1x128xf32> to vector<1x128xf32>
    %48 = vector.broadcast %47 : vector<1x128xf32> to vector<8x128xf32>
    %49 = arith.addf %45, %48 : vector<8x128xf32>
    %c7 = arith.constant 7 : index
    %c0_43 = arith.constant 0 : index
    %c0_44 = arith.constant 0 : index
    %50 = vector.load %arg2[%c7, %c0_43, %c0_44] : memref<10x128x128xf32, #tpu.memory_space<vmem>>, vector<1x128x128xf32>
    %51 = vector.shape_cast %50 : vector<1x128x128xf32> to vector<128x128xf32>
    %cst_45 = arith.constant dense<0.000000e+00> : vector<8x128xf32>
    %52 = tpu.matmul %49, %51, %cst_45 {dimension_numbers = #tpu.dot_dimension_numbers<[1], [0], [0], [1], [0, 0, 1, 1], [], []>} : vector<8x128xf32>, vector<128x128xf32>, vector<8x128xf32> -> vector<8x128xf32>
    %c7_46 = arith.constant 7 : index
    %c0_47 = arith.constant 0 : index
    %c0_48 = arith.constant 0 : index
    %53 = vector.load %arg3[%c7_46, %c0_47, %c0_48] : memref<10x1x128xf32, #tpu.memory_space<vmem>>, vector<1x1x128xf32>
    %54 = vector.shape_cast %53 : vector<1x1x128xf32> to vector<1x128xf32>
    %55 = vector.broadcast %54 : vector<1x128xf32> to vector<8x128xf32>
    %56 = arith.addf %52, %55 : vector<8x128xf32>
    %c8 = arith.constant 8 : index
    %c0_49 = arith.constant 0 : index
    %c0_50 = arith.constant 0 : index
    %57 = vector.load %arg2[%c8, %c0_49, %c0_50] : memref<10x128x128xf32, #tpu.memory_space<vmem>>, vector<1x128x128xf32>
    %58 = vector.shape_cast %57 : vector<1x128x128xf32> to vector<128x128xf32>
    %cst_51 = arith.constant dense<0.000000e+00> : vector<8x128xf32>
    %59 = tpu.matmul %56, %58, %cst_51 {dimension_numbers = #tpu.dot_dimension_numbers<[1], [0], [0], [1], [0, 0, 1, 1], [], []>} : vector<8x128xf32>, vector<128x128xf32>, vector<8x128xf32> -> vector<8x128xf32>
    %c8_52 = arith.constant 8 : index
    %c0_53 = arith.constant 0 : index
    %c0_54 = arith.constant 0 : index
    %60 = vector.load %arg3[%c8_52, %c0_53, %c0_54] : memref<10x1x128xf32, #tpu.memory_space<vmem>>, vector<1x1x128xf32>
    %61 = vector.shape_cast %60 : vector<1x1x128xf32> to vector<1x128xf32>
    %62 = vector.broadcast %61 : vector<1x128xf32> to vector<8x128xf32>
    %63 = arith.addf %59, %62 : vector<8x128xf32>
    %c9 = arith.constant 9 : index
    %c0_55 = arith.constant 0 : index
    %c0_56 = arith.constant 0 : index
    %64 = vector.load %arg2[%c9, %c0_55, %c0_56] : memref<10x128x128xf32, #tpu.memory_space<vmem>>, vector<1x128x128xf32>
    %65 = vector.shape_cast %64 : vector<1x128x128xf32> to vector<128x128xf32>
    %cst_57 = arith.constant dense<0.000000e+00> : vector<8x128xf32>
    %66 = tpu.matmul %63, %65, %cst_57 {dimension_numbers = #tpu.dot_dimension_numbers<[1], [0], [0], [1], [0, 0, 1, 1], [], []>} : vector<8x128xf32>, vector<128x128xf32>, vector<8x128xf32> -> vector<8x128xf32>
    %c9_58 = arith.constant 9 : index
    %c0_59 = arith.constant 0 : index
    %c0_60 = arith.constant 0 : index
    %67 = vector.load %arg3[%c9_58, %c0_59, %c0_60] : memref<10x1x128xf32, #tpu.memory_space<vmem>>, vector<1x1x128xf32>
    %68 = vector.shape_cast %67 : vector<1x1x128xf32> to vector<1x128xf32>
    %69 = vector.broadcast %68 : vector<1x128xf32> to vector<8x128xf32>
    %70 = arith.addf %66, %69 : vector<8x128xf32>
    %c0_61 = arith.constant 0 : index
    %c0_62 = arith.constant 0 : index
    %71 = vector.load %arg4[%c0_61, %c0_62] : memref<8x128xf32, #tpu.memory_space<vmem>>, vector<8x128xf32>
    tpu.vector_store %arg4[%c0_61, %c0_62], %70 {strides = array<i32>} : memref<8x128xf32, #tpu.memory_space<vmem>>, vector<8x128xf32>,
    return
  }
  func.func @transform_0(%arg0: i32) -> (i32, i32) {
    %c0_i32 = arith.constant 0 : i32
    %c0_i32_0 = arith.constant 0 : i32
    return %arg0, %c0_i32 : i32, i32
  }
  func.func @transform_1(%arg0: i32) -> (i32, i32, i32) {
    %c0_i32 = arith.constant 0 : i32
    %c0_i32_0 = arith.constant 0 : i32
    %c0_i32_1 = arith.constant 0 : i32
    %c0_i32_2 = arith.constant 0 : i32
    return %c0_i32, %c0_i32_0, %c0_i32_1 : i32, i32, i32
  }
  func.func @transform_2(%arg0: i32) -> (i32, i32, i32) {
    %c0_i32 = arith.constant 0 : i32
    %c0_i32_0 = arith.constant 0 : i32
    %c0_i32_1 = arith.constant 0 : i32
    %c0_i32_2 = arith.constant 0 : i32
    return %c0_i32, %c0_i32_0, %c0_i32_1 : i32, i32, i32
  }
  func.func @transform_3(%arg0: i32) -> (i32, i32) {
    %c0_i32 = arith.constant 0 : i32
    %c0_i32_0 = arith.constant 0 : i32
    return %arg0, %c0_i32 : i32, i32
  }
}

</mosaic_0001>

<bundles_post_ra>
// kernel: tpu_custom_call.1
= control target key start
LH: loop header
LB: loop body
LE: loop exit
PB: predicated region body
PF: predicated region fallthrough
CT: control target
= control target key end

     0   :  { %8 = vsyncpa [#allocation3], 0  ;;  %s2074_s0 = inlined_call_operand.hbm [shape: f32[8,128], index: 0, kind: input, shape index: {}]   ;;  %s2075_s1 = inlined_call_operand.hbm [shape: f32[10,128,128], index: 1, kind: input, shape index: {}]   ;;  %s2076_s2 = inlined_call_operand.hbm [shape: f32[10,1,128], index: 2, kind: input, shape index: {}]   ;;  %s2077_s3 = inlined_call_operand.hbm [shape: f32[8,128], index: 3, kind: output, shape index: {}]  }
   0x1   :  { %9 = vsyncpa [#allocation6], 0 }
   0x2   :  { %10 = vsyncpa [#allocation4], 0  ;;  %s1895_s12 = smov [#allocation5]   ;;  %s1801_s16 = scalar_lea.hbm %s2075_s1, 20480 }
   0x3   :  { %s26_s13 = sshll.u32 %s1895_s12, 4  ;;  %p1802_p0 = scmp.ne.s32.totalorder %s2075_s1, %s1801_s16  ;;  %s27_s13 = int_to_ptr.vmem [resolvable:$true] %s26_s13 }
   0x4   :  { %p1805_p1 = scmp.lt.u32.totalorder %s1801_s16, %s2075_s1 }
   0x6   :  { %p1807_p2 = pnand %p1805_p1, %p1802_p0 }
   0x8   :  { %1810 = shalt.err (!%p1807_p2)
}
   0x9   :  { %s1811_s21 = scalar_lea.vmem %s27_s13, 20480  ;;  %p1816_p4 = scmp.lt.s32.totalorder %s27_s13, %s27_s13 }
   0xa   :  { %p1812_p3 = scmp.ne.s32.totalorder %s27_s13, %s1811_s21  ;;  %p1817_p5 = scmp.lt.s32.totalorder %s1811_s21, %s1811_s21 }
   0xc   :  { %p1818_p6 = por %p1817_p5, %p1816_p4 }
   0xe   :  { %p1819_p7 = pnand %p1818_p6, %p1812_p3 }
  0x10   :  { %1822 = shalt.err (!%p1819_p7)
}
  0x11   :  { %s1896_s22 = smov 128   ;;  %s1897_s23 = smov 8  }
  0x12   :  { %32 = dma.hbm_to_vmem [thread:$0]  %s2075_s1, 20480, %s27_s13, [#allocation6], %s1896_s22, %s1896_s22, %s1897_s23  }
  0x13   :  { %s1898_s26 = smov [#allocation2]   ;;  %s1899_s28 = smov [#allocation7]  }
  0x14   :  { %s17_s27 = sshll.u32 %s1898_s26, 4  ;;  %s38_s29 = sshll.u32 %s1899_s28, 4  ;;  %s18_s27 = int_to_ptr.vmem [resolvable:$true] %s17_s27  ;;  %s39_s29 = int_to_ptr.vmem [resolvable:$true] %s38_s29 }
  0x15   :  { %s1823_s5 = scalar_lea.hbm %s2074_s0, 128 }
  0x16   :  { %p1824_p8 = scmp.ne.s32.totalorder %s2074_s0, %s1823_s5  ;;  %p1827_p9 = scmp.lt.u32.totalorder %s1823_s5, %s2074_s0 }
  0x18   :  { %p1829_p10 = pnand %p1827_p9, %p1824_p8 }
  0x1a   :  { %1832 = shalt.err (!%p1829_p10)
}
  0x1b   :  { %s1833_s1 = scalar_lea.vmem %s18_s27, 128  ;;  %p1838_p12 = scmp.lt.s32.totalorder %s18_s27, %s18_s27 }
  0x1c   :  { %p1834_p11 = scmp.ne.s32.totalorder %s18_s27, %s1833_s1  ;;  %p1839_p13 = scmp.lt.s32.totalorder %s1833_s1, %s1833_s1 }
  0x1e   :  { %p1840_p0 = por %p1839_p13, %p1838_p12 }
  0x20   :  { %p1841_p1 = pnand %p1840_p0, %p1834_p11 }
  0x22   :  { %1844 = shalt.err (!%p1841_p1)
}
  0x23   :  { %20 = dma.hbm_to_vmem [thread:$0]  %s2074_s0, 128, %s18_s27, [#allocation3]  }
  0x24   :  { %s1845_s14 = scalar_lea.hbm %s2076_s2, 160 }
  0x25   :  { %p1846_p2 = scmp.ne.s32.totalorder %s2076_s2, %s1845_s14  ;;  %p1849_p3 = scmp.lt.u32.totalorder %s1845_s14, %s2076_s2 }
  0x27   :  { %p1851_p4 = pnand %p1849_p3, %p1846_p2 }
  0x29   :  { %1854 = shalt.err (!%p1851_p4)
}
  0x2a   :  { %s1855_s19 = scalar_lea.vmem %s39_s29, 160  ;;  %p1860_p6 = scmp.lt.s32.totalorder %s39_s29, %s39_s29 }
  0x2b   :  { %p1856_p5 = scmp.ne.s32.totalorder %s39_s29, %s1855_s19  ;;  %p1861_p7 = scmp.lt.s32.totalorder %s1855_s19, %s1855_s19 }
  0x2d   :  { %p1862_p8 = por %p1861_p7, %p1860_p6 }
  0x2f   :  { %p1863_p9 = pnand %p1862_p8, %p1856_p5 }
  0x31   :  { %1866 = shalt.err (!%p1863_p9)
}
  0x32   :  { %s1900_s0 = smov 16   ;;  %s1901_s20 = smov 1  }
  0x33   :  { %44 = dma.hbm_to_vmem [thread:$0]  %s2076_s2, 160, %s39_s29, [#allocation6], %s1900_s0, %s1900_s0, %s1901_s20  }
  0x34   :  { %1889 = dma.done.wait [#allocation3], 128  }
  0x35   :  { %1890 = vsyncadd [#allocation3], 4294967168 }
  0x36   :  { %1891 = dma.done.wait [#allocation6], 20640  }
  0x37   :  { %1892 = vsyncadd [#allocation6], 4294946656  ;;  %v1902_v0 = vmov 0.0|0.0   ;;  %vm1903_vm0 = vmmov 0   ;;  %v1904_v1 = vmov 0.0   ;;  %v55_v2 = vld [vmem:[#allocation5] sm:$0xff] }
  0x38   :  { %1550 = vmatprep.subr.bf16.mxu0 %v1902_v0  ;;  %1232 = vmatprep.mubr.msk.f32.mxu0 %vm1903_vm0, %v1904_v1  ;;  %v56_v3 = vld [vmem:[#allocation5 + $0x8] sm:$0xff]  ;;  %v57_v4 = vld [vmem:[#allocation5 + $0x10] sm:$0xff]  ;;  %v58_v6 = vld [vmem:[#allocation5 + $0x18] sm:$0xff]  ;;  %s1905_s2 = smov [#allocation8]  }
  0x39   :  { %1574 = vmatprep.subr.bf16.mxu1 %v1902_v0  ;;  %1267 = vmatprep.mubr.msk.f32.mxu1 %vm1903_vm0, %v1904_v1  ;;  %v1551_v5 = vpack.c.bf16 %v56_v3, %v55_v2  ;;  %v1554_v7 = vpack.c.bf16 %v58_v6, %v57_v4  ;;  %v59_v8 = vld [vmem:[#allocation5 + $0x20] sm:$0xff]  ;;  %v60_v9 = vld [vmem:[#allocation5 + $0x28] sm:$0xff]  ;;  %v151_v12 = vld [vmem:[#allocation5 + $0x90] sm:$0xff]  ;;  %s1010_s23 = sshll.u32 %s1905_s2, 4  ;;  %s1011_s23 = int_to_ptr.vmem [resolvable:$true] %s1010_s23 }
  0x3a   :  { %v149_v10 = vld [vmem:[#allocation5 + $0x80] sm:$0xff]  ;;  %v150_v11 = vld [vmem:[#allocation5 + $0x88] sm:$0xff]  ;;  %v152_v13 = vld [vmem:[#allocation5 + $0x98] sm:$0xff]  ;;  %v1557_v14 = vpack.c.bf16 %v60_v9, %v59_v8  ;;  %s1867_s24 = scalar_lea.vmem %s1011_s23, 128  ;;  %p1872_p11 = scmp.lt.s32.totalorder %s1011_s23, %s1011_s23 }
  0x3b   :  { %1552 = vmatpush3.bf16.msra.mxu0 %v1551_v5  ;;  %v1575_v15 = vpack.c.bf16 %v150_v11, %v149_v10  ;;  %v61_v16 = vld [vmem:[#allocation5 + $0x30] sm:$0xff]  ;;  %v62_v17 = vld [vmem:[#allocation5 + $0x38] sm:$0xff]  ;;  %v1578_v18 = vpack.c.bf16 %v152_v13, %v151_v12  ;;  %v153_v19 = vld [vmem:[#allocation5 + $0xa0] sm:$0xff]  ;;  %p1868_p10 = scmp.ne.s32.totalorder %s1011_s23, %s1867_s24  ;;  %p1873_p12 = scmp.lt.s32.totalorder %s1867_s24, %s1867_s24 }
  0x3c   :  { %1553 = vmatprep.subr.bf16.mxu0 %v1902_v0  ;;  %v154_v20 = vld [vmem:[#allocation5 + $0xa8] sm:$0xff]  ;;  %v1560_v21 = vpack.c.bf16 %v62_v17, %v61_v16  ;;  %v63_v22 = vld [vmem:[#allocation5 + $0x40] sm:$0xff]  ;;  %v155_v25 = vld [vmem:[#allocation5 + $0xb0] sm:$0xff] }
  0x3d   :  { %1576 = vmatpush3.bf16.msra.mxu1 %v1575_v15  ;;  %v64_v23 = vld [vmem:[#allocation5 + $0x48] sm:$0xff]  ;;  %v1581_v24 = vpack.c.bf16 %v154_v20, %v153_v19  ;;  %v156_v26 = vld [vmem:[#allocation5 + $0xb8] sm:$0xff]  ;;  %v65_v28 = vld [vmem:[#allocation5 + $0x50] sm:$0xff]  ;;  %p1874_p13 = por %p1873_p12, %p1872_p11 }
  0x3e   :  { %1577 = vmatprep.subr.bf16.mxu1 %v1902_v0  ;;  %v1563_v27 = vpack.c.bf16 %v64_v23, %v63_v22  ;;  %v66_v29 = vld [vmem:[#allocation5 + $0x58] sm:$0xff]  ;;  %v1584_v30 = vpack.c.bf16 %v156_v26, %v155_v25  ;;  %v157_v31 = vld [vmem:[#allocation5 + $0xc0] sm:$0xff]  ;;  %v158_v32 = vld [vmem:[#allocation5 + $0xc8] sm:$0xff] }
  0x3f   :  { %1555 = vmatpush3.bf16.msra.mxu0 %v1554_v7  ;;  %v1566_v33 = vpack.c.bf16 %v66_v29, %v65_v28  ;;  %v67_v34 = vld [vmem:[#allocation5 + $0x60] sm:$0xff]  ;;  %v68_v35 = vld [vmem:[#allocation5 + $0x68] sm:$0xff]  ;;  %v1587_v36 = vpack.c.bf16 %v158_v32, %v157_v31  ;;  %v159_v37 = vld [vmem:[#allocation5 + $0xd0] sm:$0xff]  ;;  %p1875_p0 = pnand %p1874_p13, %p1868_p10 }
  0x40   :  { %1556 = vmatprep.subr.bf16.mxu0 %v1902_v0  ;;  %v160_v38 = vld [vmem:[#allocation5 + $0xd8] sm:$0xff]  ;;  %v1569_v39 = vpack.c.bf16 %v68_v35, %v67_v34  ;;  %v69_v40 = vld [vmem:[#allocation5 + $0x70] sm:$0xff]  ;;  %v161_v43 = vld [vmem:[#allocation5 + $0xe0] sm:$0xff] }
  0x41   :  { %1579 = vmatpush3.bf16.msra.mxu1 %v1578_v18  ;;  %v70_v41 = vld [vmem:[#allocation5 + $0x78] sm:$0xff]  ;;  %v1590_v42 = vpack.c.bf16 %v160_v38, %v159_v37  ;;  %v162_v44 = vld [vmem:[#allocation5 + $0xe8] sm:$0xff]  ;;  %v163_v48 = vld [vmem:[#allocation5 + $0xf0] sm:$0xff] }
  0x42   :  { %1580 = vmatprep.subr.bf16.mxu1 %v1902_v0  ;;  %v1572_v45 = vpack.c.bf16 %v70_v41, %v69_v40  ;;  %v1593_v46 = vpack.c.bf16 %v162_v44, %v161_v43  ;;  %v54_v47 = vld [vmem:[#allocation2] sm:$0xff]  ;;  %v244_v51 = vld [vmem:[#allocation5 + $0x100] sm:$0xff]  ;;  %v245_v52 = vld [vmem:[#allocation5 + $0x108] sm:$0xff] }
  0x43   :  { %1558 = vmatpush3.bf16.msra.mxu0 %v1557_v14  ;;  %v164_v49 = vld [vmem:[#allocation5 + $0xf8] sm:$0xff]  ;;  %v246_v53 = vld [vmem:[#allocation5 + $0x110] sm:$0xff]  ;;  %v1599_v54 = vpack.c.bf16 %v245_v52, %v244_v51  ;;  %v248_v57 = vld [vmem:[#allocation5 + $0x120] sm:$0xff] }
  0x44   :  { %1559 = vmatprep.subr.bf16.mxu0 %v1902_v0  ;;  %v1596_v50 = vpack.c.bf16 %v164_v49, %v163_v48  ;;  %v247_v55 = vld [vmem:[#allocation5 + $0x118] sm:$0xff]  ;;  %v249_v58 = vld [vmem:[#allocation5 + $0x128] sm:$0xff]  ;;  %v250_v60 = vld [vmem:[#allocation5 + $0x130] sm:$0xff] }
  0x45   :  { %1582 = vmatpush3.bf16.msra.mxu1 %v1581_v24  ;;  %v1602_v56 = vpack.c.bf16 %v247_v55, %v246_v53  ;;  %v1605_v59 = vpack.c.bf16 %v249_v58, %v248_v57  ;;  %v251_v61 = vld [vmem:[#allocation5 + $0x138] sm:$0xff]  ;;  %v252_v63 = vld [vmem:[#allocation5 + $0x140] sm:$0xff]  ;;  %v253_v2 = vld [vmem:[#allocation5 + $0x148] sm:$0xff] }
  0x46   :  { %1583 = vmatprep.subr.bf16.mxu1 %v1902_v0  ;;  %v1608_v62 = vpack.c.bf16 %v251_v61, %v250_v60  ;;  %v1611_v3 = vpack.c.bf16 %v253_v2, %v252_v63  ;;  %v254_v4 = vld [vmem:[#allocation5 + $0x150] sm:$0xff]  ;;  %v255_v5 = vld [vmem:[#allocation5 + $0x158] sm:$0xff]  ;;  %v256_v7 = vld [vmem:[#allocation5 + $0x160] sm:$0xff] }
  0x47   :  { %1561 = vmatpush3.bf16.msra.mxu0 %v1560_v21  ;;  %v1614_v6 = vpack.c.bf16 %v255_v5, %v254_v4  ;;  %v257_v8 = vld [vmem:[#allocation5 + $0x168] sm:$0xff]  ;;  %v1020_v10 = vld [vmem:[#allocation7] ss:$0 sm:$0xff]  ;;  %v258_v14 = vld [vmem:[#allocation5 + $0x170] sm:$0xff] }
  0x48   :  { %1562 = vmatprep.subr.bf16.mxu0 %v1902_v0  ;;  %v1617_v9 = vpack.c.bf16 %v257_v8, %v256_v7  ;;  %v259_v15 = vld [vmem:[#allocation5 + $0x178] sm:$0xff]  ;;  %v339_v17 = vld [vmem:[#allocation5 + $0x180] sm:$0xff]  ;;  %v340_v18 = vld [vmem:[#allocation5 + $0x188] sm:$0xff] }
  0x49   :  { %1585 = vmatpush3.bf16.msra.mxu1 %v1584_v30  ;;  %v1620_v16 = vpack.c.bf16 %v259_v15, %v258_v14  ;;  %v341_v19 = vld [vmem:[#allocation5 + $0x190] sm:$0xff]  ;;  %v1623_v20 = vpack.c.bf16 %v340_v18, %v339_v17  ;;  %v342_v21 = vld [vmem:[#allocation5 + $0x198] sm:$0xff]  ;;  %v343_v23 = vld [vmem:[#allocation5 + $0x1a0] sm:$0xff] }
  0x4a   :  { %1586 = vmatprep.subr.bf16.mxu1 %v1902_v0  ;;  %v1626_v22 = vpack.c.bf16 %v342_v21, %v341_v19  ;;  %v344_v24 = vld [vmem:[#allocation5 + $0x1a8] sm:$0xff]  ;;  %v345_v26 = vld [vmem:[#allocation5 + $0x1b0] sm:$0xff]  ;;  %v347_v29 = vld [vmem:[#allocation5 + $0x1c0] sm:$0xff] }
  0x4b   :  { %1564 = vmatpush3.bf16.msra.mxu0 %v1563_v27  ;;  %v1629_v25 = vpack.c.bf16 %v344_v24, %v343_v23  ;;  %v346_v27 = vld [vmem:[#allocation5 + $0x1b8] sm:$0xff]  ;;  %v348_v30 = vld [vmem:[#allocation5 + $0x1c8] sm:$0xff]  ;;  %v349_v32 = vld [vmem:[#allocation5 + $0x1d0] sm:$0xff] }
  0x4c   :  { %1565 = vmatprep.subr.bf16.mxu0 %v1902_v0  ;;  %v1632_v28 = vpack.c.bf16 %v346_v27, %v345_v26  ;;  %v1635_v31 = vpack.c.bf16 %v348_v30, %v347_v29  ;;  %v351_v35 = vld [vmem:[#allocation5 + $0x1e0] sm:$0xff]  ;;  %v354_v43 = vld [vmem:[#allocation5 + $0x1f8] sm:$0xff]  ;;  %v439_v52 = vld [vmem:[#allocation5 + $0x228] sm:$0xff] }
  0x4d   :  { %1588 = vmatpush3.bf16.msra.mxu1 %v1587_v36  ;;  %v352_v36 = vld [vmem:[#allocation5 + $0x1e8] sm:$0xff]  ;;  %v1021_v38 = vld [vmem:[#allocation7 + $0x1] ss:$0 sm:$0xff]  ;;  %v437_v49 = vld [vmem:[#allocation5 + $0x218] sm:$0xff] }
  0x4e   :  { %1589 = vmatprep.subr.bf16.mxu1 %v1902_v0  ;;  %v1641_v37 = vpack.c.bf16 %v352_v36, %v351_v35  ;;  %v438_v51 = vld [vmem:[#allocation5 + $0x220] sm:$0xff]  ;;  %v441_v55 = vld [vmem:[#allocation5 + $0x238] sm:$0xff]  ;;  %v443_v58 = vld [vmem:[#allocation5 + $0x248] sm:$0xff] }
  0x4f   :  { %1567 = vmatpush3.bf16.msra.mxu0 %v1566_v33  ;;  %v350_v33 = vld [vmem:[#allocation5 + $0x1d8] sm:$0xff]  ;;  %v1653_v53 = vpack.c.bf16 %v439_v52, %v438_v51  ;;  %v442_v57 = vld [vmem:[#allocation5 + $0x240] sm:$0xff]  ;;  %v444_v60 = vld [vmem:[#allocation5 + $0x250] sm:$0xff] }
  0x50   :  { %1568 = vmatprep.subr.bf16.mxu0 %v1902_v0  ;;  %v1638_v34 = vpack.c.bf16 %v350_v33, %v349_v32  ;;  %v445_v61 = vld [vmem:[#allocation5 + $0x258] sm:$0xff]  ;;  %v446_v63 = vld [vmem:[#allocation5 + $0x260] sm:$0xff]  ;;  %v447_v2 = vld [vmem:[#allocation5 + $0x268] sm:$0xff] }
  0x51   :  { %1591 = vmatpush3.bf16.msra.mxu1 %v1590_v42  ;;  %v353_v42 = vld [vmem:[#allocation5 + $0x1f0] sm:$0xff]  ;;  %v1022_v4 = vld [vmem:[#allocation7 + $0x2] ss:$0 sm:$0xff]  ;;  %v532_v15 = vld [vmem:[#allocation5 + $0x298] sm:$0xff] }
  0x52   :  { %1592 = vmatprep.subr.bf16.mxu1 %v1902_v0  ;;  %v1644_v44 = vpack.c.bf16 %v354_v43, %v353_v42  ;;  %v448_v8 = vld [vmem:[#allocation5 + $0x270] sm:$0xff]  ;;  %v533_v17 = vld [vmem:[#allocation5 + $0x2a0] sm:$0xff]  ;;  %v534_v18 = vld [vmem:[#allocation5 + $0x2a8] sm:$0xff] }
  0x53   :  { %1570 = vmatpush3.bf16.msra.mxu0 %v1569_v39  ;;  %v1677_v19 = vpack.c.bf16 %v534_v18, %v533_v17  ;;  %v536_v21 = vld [vmem:[#allocation5 + $0x2b8] sm:$0xff]  ;;  %v537_v23 = vld [vmem:[#allocation5 + $0x2c0] sm:$0xff]  ;;  %v538_v24 = vld [vmem:[#allocation5 + $0x2c8] sm:$0xff] }
  0x54   :  { %1571 = vmatprep.subr.bf16.mxu0 %v1902_v0  ;;  %v539_v26 = vld [vmem:[#allocation5 + $0x2d0] sm:$0xff]  ;;  %v540_v27 = vld [vmem:[#allocation5 + $0x2d8] sm:$0xff]  ;;  %v541_v29 = vld [vmem:[#allocation5 + $0x2e0] sm:$0xff] }
  0x55   :  { %1594 = vmatpush3.bf16.msra.mxu1 %v1593_v46  ;;  %v435_v46 = vld [vmem:[#allocation5 + $0x208] sm:$0xff]  ;;  %v1023_v32 = vld [vmem:[#allocation7 + $0x3] ss:$0 sm:$0xff]  ;;  %v543_v36 = vld [vmem:[#allocation5 + $0x2f0] sm:$0xff] }
  0x56   :  { %1595 = vmatprep.subr.bf16.mxu1 %v1902_v0  ;;  %v542_v30 = vld [vmem:[#allocation5 + $0x2e8] sm:$0xff]  ;;  %v627_v43 = vld [vmem:[#allocation5 + $0x318] sm:$0xff]  ;;  %v632_v51 = vld [vmem:[#allocation5 + $0x340] sm:$0xff] }
  0x57   :  { %1573 = vmatpush3.bf16.msra.mxu0 %v1572_v45  ;;  %v434_v45 = vld [vmem:[#allocation5 + $0x200] sm:$0xff]  ;;  %v633_v52 = vld [vmem:[#allocation5 + $0x348] sm:$0xff] }
  0x58   :  { %1598 = vmatprep.subr.bf16.mxu0 %v1902_v0  ;;  %v1647_v48 = vpack.c.bf16 %v435_v46, %v434_v45  ;;  %v628_v45 = vld [vmem:[#allocation5 + $0x320] sm:$0xff]  ;;  %v629_v46 = vld [vmem:[#allocation5 + $0x328] sm:$0xff] }
  0x59   :  { %1597 = vmatpush3.bf16.msra.mxu1 %v1596_v50  ;;  %v727_v17 = vld [vmem:[#allocation5 + $0x3c0] sm:$0xff]  ;;  %v728_v18 = vld [vmem:[#allocation5 + $0x3c8] sm:$0xff] }
  0x5a   :  { %1233 = vmatmul.mubr.f32.vlgmr.msra.gmra.mrb[0].mxu0 %v54_v47  ;;  %1622 = vmatprep.subr.bf16.mxu1 %v1902_v0  ;;  %v436_v47 = vld [vmem:[#allocation5 + $0x210] sm:$0xff] }
  0x5b   :  { %1302 = vmatprep.mubr.msk.f32.mxu0 %vm1903_vm0, %v1904_v1  ;;  %1600 = vmatpush3.bf16.msra.mxu0 %v1599_v54  ;;  %v1650_v50 = vpack.c.bf16 %v437_v49, %v436_v47  ;;  %v440_v54 = vld [vmem:[#allocation5 + $0x230] sm:$0xff]  ;;  %v1701_v47 = vpack.c.bf16 %v629_v46, %v628_v45  ;;  %v631_v49 = vld [vmem:[#allocation5 + $0x338] sm:$0xff]  ;;  %v822_v45 = vld [vmem:[#allocation5 + $0x440] sm:$0xff] }
  0x5c   :  { %1601 = vmatprep.subr.bf16.mxu0 %v1902_v0  ;;  %v823_v46 = vld [vmem:[#allocation5 + $0x448] sm:$0xff] }
  0x5f   :  { %1603 = vmatpush3.bf16.msra.mxu0 %v1602_v56  ;;  %v1656_v56 = vpack.c.bf16 %v441_v55, %v440_v54  ;;  %v634_v54 = vld [vmem:[#allocation5 + $0x350] sm:$0xff]  ;;  %v635_v55 = vld [vmem:[#allocation5 + $0x358] sm:$0xff] }
  0x60   :  { %1604 = vmatprep.subr.bf16.mxu0 %v1902_v0 }
  0x63   :  { %1606 = vmatpush3.bf16.msra.mxu0 %v1605_v59  ;;  %v1659_v59 = vpack.c.bf16 %v443_v58, %v442_v57  ;;  %v636_v57 = vld [vmem:[#allocation5 + $0x360] sm:$0xff]  ;;  %v637_v58 = vld [vmem:[#allocation5 + $0x368] sm:$0xff] }
  0x64   :  { %1607 = vmatprep.subr.bf16.mxu0 %v1902_v0 }
  0x67   :  { %1609 = vmatpush3.bf16.msra.mxu0 %v1608_v62  ;;  %v1662_v62 = vpack.c.bf16 %v445_v61, %v444_v60  ;;  %v1024_v60 = vld [vmem:[#allocation7 + $0x4] ss:$0 sm:$0xff] }
  0x68   :  { %1610 = vmatprep.subr.bf16.mxu0 %v1902_v0 }
  0x6b   :  { %1612 = vmatpush3.bf16.msra.mxu0 %v1611_v3  ;;  %v1665_v3 = vpack.c.bf16 %v447_v2, %v446_v63  ;;  %v638_v2 = vld [vmem:[#allocation5 + $0x370] sm:$0xff] }
  0x6c   :  { %1613 = vmatprep.subr.bf16.mxu0 %v1902_v0 }
  0x6f   :  { %1615 = vmatpush3.bf16.msra.mxu0 %v1614_v6 }
  0x70   :  { %1616 = vmatprep.subr.bf16.mxu0 %v1902_v0 }
  0x73   :  { %1618 = vmatpush3.bf16.msra.mxu0 %v1617_v9  ;;  %v449_v9 = vld [vmem:[#allocation5 + $0x278] sm:$0xff] }
  0x74   :  { %1619 = vmatprep.subr.bf16.mxu0 %v1902_v0 }
  0x77   :  { %1621 = vmatpush3.bf16.msra.mxu0 %v1620_v16 }
  0x78   :  { %1646 = vmatprep.subr.bf16.mxu0 %v1902_v0 }
 0x12d   :  { %v144_v11 = vpop.f32.mrb[0].mxu0 }
 0x12e   :  { %v145_v12 = vadd.f32 %v1020_v10, %v144_v11  ;;  %v1234_v13 = vpop.f32.mrb[1].mxu0  ;;  %v1668_v10 = vpack.c.bf16 %v449_v9, %v448_v8  ;;  %v529_v11 = vld [vmem:[#allocation5 + $0x280] sm:$0xff]  ;;  %v722_v9 = vld [vmem:[#allocation5 + $0x398] sm:$0xff] }
 0x12f   :  { %v531_v13 = vld [vmem:[#allocation5 + $0x290] sm:$0xff] }
 0x130   :  { %1268 = vmatmul.mubr.f32.vlgmr.msra.gmra.mrb[0].mxu1 %v145_v12  ;;  %v530_v12 = vld [vmem:[#allocation5 + $0x288] sm:$0xff]  ;;  %v1674_v16 = vpack.c.bf16 %v532_v15, %v531_v13  ;;  %v726_v15 = vld [vmem:[#allocation5 + $0x3b8] sm:$0xff] }
 0x131   :  { %1337 = vmatprep.mubr.msk.f32.mxu1 %vm1903_vm0, %v1904_v1  ;;  %1624 = vmatpush3.bf16.msra.mxu1 %v1623_v20  ;;  %v1671_v14 = vpack.c.bf16 %v530_v12, %v529_v11  ;;  %v535_v20 = vld [vmem:[#allocation5 + $0x2b0] sm:$0xff]  ;;  %v723_v11 = vld [vmem:[#allocation5 + $0x3a0] sm:$0xff]  ;;  %v724_v12 = vld [vmem:[#allocation5 + $0x3a8] sm:$0xff] }
 0x132   :  { %1625 = vmatprep.subr.bf16.mxu1 %v1902_v0  ;;  %v1725_v13 = vpack.c.bf16 %v724_v12, %v723_v11  ;;  %v918_v11 = vld [vmem:[#allocation5 + $0x4c8] sm:$0xff] }
 0x135   :  { %1627 = vmatpush3.bf16.msra.mxu1 %v1626_v22  ;;  %v1680_v22 = vpack.c.bf16 %v536_v21, %v535_v20  ;;  %v729_v20 = vld [vmem:[#allocation5 + $0x3d0] sm:$0xff]  ;;  %v730_v21 = vld [vmem:[#allocation5 + $0x3d8] sm:$0xff] }
 0x136   :  { %1628 = vmatprep.subr.bf16.mxu1 %v1902_v0 }
 0x139   :  { %1630 = vmatpush3.bf16.msra.mxu1 %v1629_v25  ;;  %v1683_v25 = vpack.c.bf16 %v538_v24, %v537_v23  ;;  %v731_v23 = vld [vmem:[#allocation5 + $0x3e0] sm:$0xff]  ;;  %v732_v24 = vld [vmem:[#allocation5 + $0x3e8] sm:$0xff] }
 0x13a   :  { %1631 = vmatprep.subr.bf16.mxu1 %v1902_v0 }
 0x13d   :  { %1633 = vmatpush3.bf16.msra.mxu1 %v1632_v28  ;;  %v1686_v28 = vpack.c.bf16 %v540_v27, %v539_v26  ;;  %v1025_v26 = vld [vmem:[#allocation7 + $0x5] ss:$0 sm:$0xff] }
 0x13e   :  { %1634 = vmatprep.subr.bf16.mxu1 %v1902_v0 }
 0x141   :  { %1636 = vmatpush3.bf16.msra.mxu1 %v1635_v31  ;;  %v1689_v31 = vpack.c.bf16 %v542_v30, %v541_v29  ;;  %v733_v30 = vld [vmem:[#allocation5 + $0x3f0] sm:$0xff] }
 0x142   :  { %1637 = vmatprep.subr.bf16.mxu1 %v1902_v0 }
 0x145   :  { %1639 = vmatpush3.bf16.msra.mxu1 %v1638_v34 }
 0x146   :  { %1640 = vmatprep.subr.bf16.mxu1 %v1902_v0 }
 0x149   :  { %1642 = vmatpush3.bf16.msra.mxu1 %v1641_v37  ;;  %v544_v37 = vld [vmem:[#allocation5 + $0x2f8] sm:$0xff] }
 0x14a   :  { %1643 = vmatprep.subr.bf16.mxu1 %v1902_v0 }
 0x14d   :  { %1645 = vmatpush3.bf16.msra.mxu1 %v1644_v44 }
 0x14e   :  { %1670 = vmatprep.subr.bf16.mxu1 %v1902_v0 }
 0x203   :  { %v239_v39 = vpop.f32.mrb[0].mxu1 }
 0x204   :  { %v240_v40 = vadd.f32 %v1021_v38, %v239_v39  ;;  %v1269_v41 = vpop.f32.mrb[1].mxu1  ;;  %v1692_v38 = vpack.c.bf16 %v544_v37, %v543_v36  ;;  %v624_v39 = vld [vmem:[#allocation5 + $0x300] sm:$0xff]  ;;  %v817_v37 = vld [vmem:[#allocation5 + $0x418] sm:$0xff] }
 0x205   :  { %v626_v41 = vld [vmem:[#allocation5 + $0x310] sm:$0xff] }
 0x206   :  { %1303 = vmatmul.mubr.f32.vlgmr.msra.gmra.mrb[2].mxu0 %v240_v40  ;;  %v625_v40 = vld [vmem:[#allocation5 + $0x308] sm:$0xff]  ;;  %v1698_v44 = vpack.c.bf16 %v627_v43, %v626_v41  ;;  %v821_v43 = vld [vmem:[#allocation5 + $0x438] sm:$0xff] }
 0x207   :  { %1372 = vmatprep.mubr.msk.f32.mxu0 %vm1903_vm0, %v1904_v1  ;;  %1648 = vmatpush3.bf16.msra.mxu0 %v1647_v48  ;;  %v1695_v42 = vpack.c.bf16 %v625_v40, %v624_v39  ;;  %v630_v48 = vld [vmem:[#allocation5 + $0x330] sm:$0xff]  ;;  %v818_v39 = vld [vmem:[#allocation5 + $0x420] sm:$0xff]  ;;  %v819_v40 = vld [vmem:[#allocation5 + $0x428] sm:$0xff] }
 0x208   :  { %1649 = vmatprep.subr.bf16.mxu0 %v1902_v0  ;;  %v1749_v41 = vpack.c.bf16 %v819_v40, %v818_v39 }
 0x20b   :  { %1651 = vmatpush3.bf16.msra.mxu0 %v1650_v50  ;;  %v1704_v50 = vpack.c.bf16 %v631_v49, %v630_v48  ;;  %v824_v48 = vld [vmem:[#allocation5 + $0x450] sm:$0xff]  ;;  %v825_v49 = vld [vmem:[#allocation5 + $0x458] sm:$0xff] }
 0x20c   :  { %1652 = vmatprep.subr.bf16.mxu0 %v1902_v0 }
 0x20f   :  { %1654 = vmatpush3.bf16.msra.mxu0 %v1653_v53  ;;  %v1707_v53 = vpack.c.bf16 %v633_v52, %v632_v51  ;;  %v826_v51 = vld [vmem:[#allocation5 + $0x460] sm:$0xff]  ;;  %v827_v52 = vld [vmem:[#allocation5 + $0x468] sm:$0xff] }
 0x210   :  { %1655 = vmatprep.subr.bf16.mxu0 %v1902_v0 }
 0x213   :  { %1657 = vmatpush3.bf16.msra.mxu0 %v1656_v56  ;;  %v1710_v56 = vpack.c.bf16 %v635_v55, %v634_v54  ;;  %v1026_v54 = vld [vmem:[#allocation7 + $0x6] ss:$0 sm:$0xff] }
 0x214   :  { %1658 = vmatprep.subr.bf16.mxu0 %v1902_v0 }
 0x217   :  { %1660 = vmatpush3.bf16.msra.mxu0 %v1659_v59  ;;  %v1713_v59 = vpack.c.bf16 %v637_v58, %v636_v57  ;;  %v828_v58 = vld [vmem:[#allocation5 + $0x470] sm:$0xff] }
 0x218   :  { %1661 = vmatprep.subr.bf16.mxu0 %v1902_v0 }
 0x21b   :  { %1663 = vmatpush3.bf16.msra.mxu0 %v1662_v62 }
 0x21c   :  { %1664 = vmatprep.subr.bf16.mxu0 %v1902_v0 }
 0x21f   :  { %1666 = vmatpush3.bf16.msra.mxu0 %v1665_v3  ;;  %v639_v3 = vld [vmem:[#allocation5 + $0x378] sm:$0xff] }
 0x220   :  { %1667 = vmatprep.subr.bf16.mxu0 %v1902_v0 }
 0x223   :  { %1669 = vmatpush3.bf16.msra.mxu0 %v1668_v10 }
 0x224   :  { %1694 = vmatprep.subr.bf16.mxu0 %v1902_v0 }
 0x2d9   :  { %v334_v5 = vpop.f32.mrb[2].mxu0 }
 0x2da   :  { %v335_v6 = vadd.f32 %v1022_v4, %v334_v5  ;;  %v1304_v7 = vpop.f32.mrb[3].mxu0  ;;  %v1716_v4 = vpack.c.bf16 %v639_v3, %v638_v2  ;;  %v719_v5 = vld [vmem:[#allocation5 + $0x380] sm:$0xff]  ;;  %v912_v3 = vld [vmem:[#allocation5 + $0x498] sm:$0xff] }
 0x2db   :  { %v721_v7 = vld [vmem:[#allocation5 + $0x390] sm:$0xff] }
 0x2dc   :  { %1338 = vmatmul.mubr.f32.vlgmr.msra.gmra.mrb[2].mxu1 %v335_v6  ;;  %v720_v6 = vld [vmem:[#allocation5 + $0x388] sm:$0xff]  ;;  %v1722_v10 = vpack.c.bf16 %v722_v9, %v721_v7 }
 0x2dd   :  { %1407 = vmatprep.mubr.msk.f32.mxu1 %vm1903_vm0, %v1904_v1  ;;  %1672 = vmatpush3.bf16.msra.mxu1 %v1671_v14  ;;  %v1719_v8 = vpack.c.bf16 %v720_v6, %v719_v5  ;;  %v725_v14 = vld [vmem:[#allocation5 + $0x3b0] sm:$0xff]  ;;  %v913_v5 = vld [vmem:[#allocation5 + $0x4a0] sm:$0xff]  ;;  %v914_v6 = vld [vmem:[#allocation5 + $0x4a8] sm:$0xff] }
 0x2de   :  { %1673 = vmatprep.subr.bf16.mxu1 %v1902_v0  ;;  %v1773_v7 = vpack.c.bf16 %v914_v6, %v913_v5 }
 0x2e1   :  { %1675 = vmatpush3.bf16.msra.mxu1 %v1674_v16  ;;  %v1728_v16 = vpack.c.bf16 %v726_v15, %v725_v14  ;;  %v920_v14 = vld [vmem:[#allocation5 + $0x4d8] sm:$0xff] }
 0x2e2   :  { %1676 = vmatprep.subr.bf16.mxu1 %v1902_v0 }
 0x2e5   :  { %1678 = vmatpush3.bf16.msra.mxu1 %v1677_v19  ;;  %v1731_v19 = vpack.c.bf16 %v728_v18, %v727_v17  ;;  %v922_v17 = vld [vmem:[#allocation5 + $0x4e8] sm:$0xff] }
 0x2e6   :  { %1679 = vmatprep.subr.bf16.mxu1 %v1902_v0 }
 0x2e9   :  { %1681 = vmatpush3.bf16.msra.mxu1 %v1680_v22  ;;  %v1734_v22 = vpack.c.bf16 %v730_v21, %v729_v20 }
 0x2ea   :  { %1682 = vmatprep.subr.bf16.mxu1 %v1902_v0 }
 0x2ed   :  { %1684 = vmatpush3.bf16.msra.mxu1 %v1683_v25  ;;  %v1737_v25 = vpack.c.bf16 %v732_v24, %v731_v23  ;;  %v923_v23 = vld [vmem:[#allocation5 + $0x4f0] sm:$0xff]  ;;  %v924_v24 = vld [vmem:[#allocation5 + $0x4f8] sm:$0xff] }
 0x2ee   :  { %1685 = vmatprep.subr.bf16.mxu1 %v1902_v0 }
 0x2f1   :  { %1687 = vmatpush3.bf16.msra.mxu1 %v1686_v28 }
 0x2f2   :  { %1688 = vmatprep.subr.bf16.mxu1 %v1902_v0 }
 0x2f5   :  { %1690 = vmatpush3.bf16.msra.mxu1 %v1689_v31  ;;  %v734_v31 = vld [vmem:[#allocation5 + $0x3f8] sm:$0xff] }
 0x2f6   :  { %1691 = vmatprep.subr.bf16.mxu1 %v1902_v0 }
 0x2f9   :  { %1693 = vmatpush3.bf16.msra.mxu1 %v1692_v38 }
 0x2fa   :  { %1718 = vmatprep.subr.bf16.mxu1 %v1902_v0 }
 0x3af   :  { %v429_v33 = vpop.f32.mrb[2].mxu1 }
 0x3b0   :  { %v430_v34 = vadd.f32 %v1023_v32, %v429_v33  ;;  %v1339_v35 = vpop.f32.mrb[3].mxu1  ;;  %v1740_v32 = vpack.c.bf16 %v734_v31, %v733_v30  ;;  %v814_v33 = vld [vmem:[#allocation5 + $0x400] sm:$0xff]  ;;  %v1029_v30 = vld [vmem:[#allocation7 + $0x9] ss:$0 sm:$0xff] }
 0x3b1   :  { %v816_v35 = vld [vmem:[#allocation5 + $0x410] sm:$0xff] }
 0x3b2   :  { %1373 = vmatmul.mubr.f32.vlgmr.msra.gmra.mrb[4].mxu0 %v430_v34  ;;  %v815_v34 = vld [vmem:[#allocation5 + $0x408] sm:$0xff]  ;;  %v1746_v38 = vpack.c.bf16 %v817_v37, %v816_v35 }
 0x3b3   :  { %1442 = vmatprep.mubr.msk.f32.mxu0 %vm1903_vm0, %v1904_v1  ;;  %1696 = vmatpush3.bf16.msra.mxu0 %v1695_v42  ;;  %v1743_v36 = vpack.c.bf16 %v815_v34, %v814_v33  ;;  %v820_v42 = vld [vmem:[#allocation5 + $0x430] sm:$0xff] }
 0x3b4   :  { %1697 = vmatprep.subr.bf16.mxu0 %v1902_v0 }
 0x3b7   :  { %1699 = vmatpush3.bf16.msra.mxu0 %v1698_v44  ;;  %v1752_v44 = vpack.c.bf16 %v821_v43, %v820_v42 }
 0x3b8   :  { %1700 = vmatprep.subr.bf16.mxu0 %v1902_v0 }
 0x3bb   :  { %1702 = vmatpush3.bf16.msra.mxu0 %v1701_v47  ;;  %v1755_v47 = vpack.c.bf16 %v823_v46, %v822_v45 }
 0x3bc   :  { %1703 = vmatprep.subr.bf16.mxu0 %v1902_v0 }
 0x3bf   :  { %1705 = vmatpush3.bf16.msra.mxu0 %v1704_v50  ;;  %v1758_v50 = vpack.c.bf16 %v825_v49, %v824_v48 }
 0x3c0   :  { %1706 = vmatprep.subr.bf16.mxu0 %v1902_v0 }
 0x3c3   :  { %1708 = vmatpush3.bf16.msra.mxu0 %v1707_v53  ;;  %v1761_v53 = vpack.c.bf16 %v827_v52, %v826_v51 }
 0x3c4   :  { %1709 = vmatprep.subr.bf16.mxu0 %v1902_v0 }
 0x3c7   :  { %1711 = vmatpush3.bf16.msra.mxu0 %v1710_v56 }
 0x3c8   :  { %1712 = vmatprep.subr.bf16.mxu0 %v1902_v0 }
 0x3cb   :  { %1714 = vmatpush3.bf16.msra.mxu0 %v1713_v59  ;;  %v829_v59 = vld [vmem:[#allocation5 + $0x478] sm:$0xff] }
 0x3cc   :  { %1715 = vmatprep.subr.bf16.mxu0 %v1902_v0 }
 0x3cf   :  { %1717 = vmatpush3.bf16.msra.mxu0 %v1716_v4 }
 0x3d0   :  { %1742 = vmatprep.subr.bf16.mxu0 %v1902_v0 }
 0x485   :  { %v524_v61 = vpop.f32.mrb[4].mxu0 }
 0x486   :  { %v525_v62 = vadd.f32 %v1024_v60, %v524_v61  ;;  %v1374_v63 = vpop.f32.mrb[5].mxu0  ;;  %v1764_v60 = vpack.c.bf16 %v829_v59, %v828_v58  ;;  %v909_v61 = vld [vmem:[#allocation5 + $0x480] sm:$0xff] }
 0x487   :  { %v911_v63 = vld [vmem:[#allocation5 + $0x490] sm:$0xff] }
 0x488   :  { %1408 = vmatmul.mubr.f32.vlgmr.msra.gmra.mrb[4].mxu1 %v525_v62  ;;  %v910_v62 = vld [vmem:[#allocation5 + $0x488] sm:$0xff]  ;;  %v1770_v4 = vpack.c.bf16 %v912_v3, %v911_v63 }
 0x489   :  { %1477 = vmatprep.mubr.msk.f32.mxu1 %vm1903_vm0, %v1904_v1  ;;  %1720 = vmatpush3.bf16.msra.mxu1 %v1719_v8  ;;  %v1767_v2 = vpack.c.bf16 %v910_v62, %v909_v61  ;;  %v916_v8 = vld [vmem:[#allocation5 + $0x4b8] sm:$0xff] }
 0x48a   :  { %1721 = vmatprep.subr.bf16.mxu1 %v1902_v0 }
 0x48d   :  { %1723 = vmatpush3.bf16.msra.mxu1 %v1722_v10  ;;  %v917_v10 = vld [vmem:[#allocation5 + $0x4c0] sm:$0xff] }
 0x48e   :  { %1724 = vmatprep.subr.bf16.mxu1 %v1902_v0  ;;  %v1779_v12 = vpack.c.bf16 %v918_v11, %v917_v10 }
 0x491   :  { %1726 = vmatpush3.bf16.msra.mxu1 %v1725_v13  ;;  %v919_v13 = vld [vmem:[#allocation5 + $0x4d0] sm:$0xff] }
 0x492   :  { %1727 = vmatprep.subr.bf16.mxu1 %v1902_v0  ;;  %v1782_v15 = vpack.c.bf16 %v920_v14, %v919_v13 }
 0x495   :  { %1729 = vmatpush3.bf16.msra.mxu1 %v1728_v16  ;;  %v921_v16 = vld [vmem:[#allocation5 + $0x4e0] sm:$0xff] }
 0x496   :  { %1730 = vmatprep.subr.bf16.mxu1 %v1902_v0  ;;  %v1785_v18 = vpack.c.bf16 %v922_v17, %v921_v16 }
 0x499   :  { %1732 = vmatpush3.bf16.msra.mxu1 %v1731_v19  ;;  %v1027_v19 = vld [vmem:[#allocation7 + $0x7] ss:$0 sm:$0xff] }
 0x49a   :  { %1733 = vmatprep.subr.bf16.mxu1 %v1902_v0 }
 0x49d   :  { %1735 = vmatpush3.bf16.msra.mxu1 %v1734_v22 }
 0x49e   :  { %1736 = vmatprep.subr.bf16.mxu1 %v1902_v0 }
 0x4a1   :  { %1738 = vmatpush3.bf16.msra.mxu1 %v1737_v25  ;;  %v1788_v25 = vpack.c.bf16 %v924_v24, %v923_v23 }
 0x4a2   :  { %1739 = vmatprep.subr.bf16.mxu1 %v1902_v0 }
 0x4a5   :  { %1741 = vmatpush3.bf16.msra.mxu1 %v1740_v32 }
 0x4a6   :  { %1766 = vmatprep.subr.bf16.mxu1 %v1902_v0 }
 0x55b   :  { %v619_v27 = vpop.f32.mrb[4].mxu1 }
 0x55c   :  { %v620_v28 = vadd.f32 %v1025_v26, %v619_v27  ;;  %v1409_v29 = vpop.f32.mrb[5].mxu1  ;;  %v1028_v26 = vld [vmem:[#allocation7 + $0x8] ss:$0 sm:$0xff] }
 0x55e   :  { %1443 = vmatmul.mubr.f32.vlgmr.msra.gmra.mrb[6].mxu0 %v620_v28 }
 0x55f   :  { %1512 = vmatprep.mubr.msk.f32.mxu0 %vm1903_vm0, %v1904_v1  ;;  %1744 = vmatpush3.bf16.msra.mxu0 %v1743_v36 }
 0x560   :  { %1745 = vmatprep.subr.bf16.mxu0 %v1902_v0 }
 0x563   :  { %1747 = vmatpush3.bf16.msra.mxu0 %v1746_v38 }
 0x564   :  { %1748 = vmatprep.subr.bf16.mxu0 %v1902_v0 }
 0x567   :  { %1750 = vmatpush3.bf16.msra.mxu0 %v1749_v41 }
 0x568   :  { %1751 = vmatprep.subr.bf16.mxu0 %v1902_v0 }
 0x56b   :  { %1753 = vmatpush3.bf16.msra.mxu0 %v1752_v44 }
 0x56c   :  { %1754 = vmatprep.subr.bf16.mxu0 %v1902_v0 }
 0x56f   :  { %1756 = vmatpush3.bf16.msra.mxu0 %v1755_v47 }
 0x570   :  { %1757 = vmatprep.subr.bf16.mxu0 %v1902_v0 }
 0x573   :  { %1759 = vmatpush3.bf16.msra.mxu0 %v1758_v50 }
 0x574   :  { %1760 = vmatprep.subr.bf16.mxu0 %v1902_v0 }
 0x577   :  { %1762 = vmatpush3.bf16.msra.mxu0 %v1761_v53 }
 0x578   :  { %1763 = vmatprep.subr.bf16.mxu0 %v1902_v0 }
 0x57b   :  { %1765 = vmatpush3.bf16.msra.mxu0 %v1764_v60 }
 0x631   :  { %v714_v55 = vpop.f32.mrb[6].mxu0 }
 0x632   :  { %v715_v56 = vadd.f32 %v1026_v54, %v714_v55  ;;  %v1444_v57 = vpop.f32.mrb[7].mxu0 }
 0x634   :  { %1478 = vmatmul.mubr.f32.vlgmr.msra.gmra.mrb[6].mxu1 %v715_v56 }
 0x635   :  { %1547 = vmatprep.mubr.msk.f32.mxu1 %vm1903_vm0, %v1904_v1  ;;  %1768 = vmatpush3.bf16.msra.mxu1 %v1767_v2  ;;  %v915_v1 = vld [vmem:[#allocation5 + $0x4b0] sm:$0xff] }
 0x636   :  { %1769 = vmatprep.subr.bf16.mxu1 %v1902_v0  ;;  %v1776_v9 = vpack.c.bf16 %v916_v8, %v915_v1 }
 0x639   :  { %1771 = vmatpush3.bf16.msra.mxu1 %v1770_v4 }
 0x63a   :  { %1772 = vmatprep.subr.bf16.mxu1 %v1902_v0 }
 0x63d   :  { %1774 = vmatpush3.bf16.msra.mxu1 %v1773_v7 }
 0x63e   :  { %1775 = vmatprep.subr.bf16.mxu1 %v1902_v0 }
 0x641   :  { %1777 = vmatpush3.bf16.msra.mxu1 %v1776_v9 }
 0x642   :  { %1778 = vmatprep.subr.bf16.mxu1 %v1902_v0 }
 0x645   :  { %1780 = vmatpush3.bf16.msra.mxu1 %v1779_v12 }
 0x646   :  { %1781 = vmatprep.subr.bf16.mxu1 %v1902_v0 }
 0x649   :  { %1783 = vmatpush3.bf16.msra.mxu1 %v1782_v15 }
 0x64a   :  { %1784 = vmatprep.subr.bf16.mxu1 %v1902_v0 }
 0x64d   :  { %1786 = vmatpush3.bf16.msra.mxu1 %v1785_v18 }
 0x64e   :  { %1787 = vmatprep.subr.bf16.mxu1 %v1902_v0 }
 0x651   :  { %1789 = vmatpush3.bf16.msra.mxu1 %v1788_v25 }
 0x707   :  { %v809_v20 = vpop.f32.mrb[6].mxu1 }
 0x708   :  { %v810_v21 = vadd.f32 %v1027_v19, %v809_v20  ;;  %v1479_v22 = vpop.f32.mrb[7].mxu1 }
 0x70a   :  { %1513 = vmatmul.mubr.f32.vlgmr.msra.gmra.mrb[8].mxu0 %v810_v21 }
 0x7dd   :  { %v904_v27 = vpop.f32.mrb[8].mxu0 }
 0x7de   :  { %v905_v28 = vadd.f32 %v1028_v26, %v904_v27  ;;  %v1514_v29 = vpop.f32.mrb[9].mxu0 }
 0x7e0   :  { %1548 = vmatmul.mubr.f32.vlgmr.msra.gmra.mrb[8].mxu1 %v905_v28 }
 0x8b3   :  { %v999_v31 = vpop.f32.mrb[8].mxu1 }
 0x8b4   :  { %v1000_v32 = vadd.f32 %v1029_v30, %v999_v31  ;;  %v1549_v0 = vpop.f32.mrb[9].mxu1 }
 0x8b6   :  { %1003 = vst [vmem:[#allocation8] sm:$0xff] %v1000_v32 }
 0x8b7   :  { %1878 = shalt.err (!%p1875_p0)
}
 0x8b8   :  { %s1879_s27 = scalar_lea.hbm %s2077_s3, 128 }
 0x8b9   :  { %p1880_p1 = scmp.ne.s32.totalorder %s2077_s3, %s1879_s27  ;;  %p1883_p2 = scmp.lt.u32.totalorder %s1879_s27, %s2077_s3 }
 0x8bb   :  { %p1885_p3 = pnand %p1883_p2, %p1880_p1 }
 0x8bd   :  { %1888 = shalt.err (!%p1885_p3)
}
 0x8be   :  { %1013 = dma.vmem_to_hbm [thread:$0]  %s1011_s23, 128, %s2077_s3, [#allocation4]  }
 0x8bf   :  { %1893 = dma.done.wait [#allocation4], 128  }
 0x8c0   :  { %1894 = vsyncadd [#allocation4], 4294967168 }
 0x8c1   :  { %1017 = vsyncpa [#allocation3], 1 }
 0x8c2   :  { %1018 = vsyncpa [#allocation6], 1 }
 0x8c3   :  { %1019 = vsyncpa [#allocation4], 1 }

</bundles_post_ra>
